<compile_context>
chip_gen: v6e
topology: v6e:2x2x1
jax: 0.10.0
libtpu: 0.0.40
codegen_flags: <defaults>
</compile_context>

<pallas_src>
import math

import numpy as np

import jax
import jax.numpy as jnp
from jax.experimental import pallas as pl
from jax.experimental.pallas import tpu as pltpu


def _embedding_forward_kernel(c_ref, n_ref, u_ref, c_out_ref, n_out_ref, u_out_ref):
    # Identity forward: pass the parameter tiles through unchanged.
    c_out_ref[...] = c_ref[...]
    n_out_ref[...] = n_ref[...]
    u_out_ref[...] = u_ref[...]


def _sublane_multiple(dtype):
    """Sublane packing granularity for the given dtype (f32: 8, bf16: 16, i8: 32)."""
    itemsize = jnp.dtype(dtype).itemsize
    return max(8, (4 // max(itemsize, 1)) * 8)


def embedding_layer_forward(c_emb, n_emb, u_emb, *, row_tile=1024):
    """Pallas equivalent of EmbeddingLayer.forward() -> (c, n, u).

    Outputs are aliased to the inputs (identity), so the "copy" costs
    essentially nothing; the row-tiled grid only matters when code_num grows
    to realistic embedding-table sizes, in which case the pass-through is
    pipelined instead of one giant serialized DMA.
    """
    code_num = c_emb.shape[0]
    assert n_emb.shape[0] == code_num and u_emb.shape[0] == code_num

    # Row tile: full array when small, otherwise a multiple of the sublane
    # packing granularity (8/16/32 depending on dtype) per the (8,128) rule.
    sub = _sublane_multiple(c_emb.dtype)
    if code_num <= row_tile:
        tm = code_num
    else:
        tm = max(sub, (row_tile // sub) * sub)

    grid = (pl.cdiv(code_num, tm),)

    def spec(arr):
        # Last dim kept as the full array dim (lane-dense output, satisfies the
        # (8,128) rule even for narrow tables); rows tiled along the grid.
        return pl.BlockSpec((tm, arr.shape[1]), lambda i: (i, 0))

    return pl.pallas_call(
        _embedding_forward_kernel,
        grid=grid,
        in_specs=[spec(c_emb), spec(n_emb), spec(u_emb)],
        out_specs=(spec(c_emb), spec(n_emb), spec(u_emb)),
        out_shape=(
            jax.ShapeDtypeStruct(c_emb.shape, c_emb.dtype),
            jax.ShapeDtypeStruct(n_emb.shape, n_emb.dtype),
            jax.ShapeDtypeStruct(u_emb.shape, u_emb.dtype),
        ),
        # Outputs alias inputs: identity forward, zero new HBM allocation.
        input_output_aliases={0: 0, 1: 1, 2: 2},
        compiler_params=pltpu.CompilerParams(
            dimension_semantics=("parallel",),
        ),
    )(c_emb, n_emb, u_emb)


def xavier_uniform(key, shape, dtype=jnp.float32):
    """Matches torch.nn.init.xavier_uniform_ (gain=1) for a 2-D tensor."""
    fan_out, fan_in = shape[0], shape[1]
    limit = math.sqrt(6.0 / (fan_in + fan_out))
    return jax.random.uniform(key, shape, dtype=dtype, minval=-limit, maxval=limit)


if __name__ == "__main__":
    # Small shapes implied by __init__: (code_num, code_size), (code_num, graph_size)
    code_num, code_size, graph_size = 8, 32, 64

    key = jax.random.PRNGKey(0)
    k_c, k_n, k_u = jax.random.split(key, 3)

    c_embeddings = xavier_uniform(k_c, (code_num, code_size))
    n_embeddings = xavier_uniform(k_n, (code_num, code_size))
    u_embeddings = xavier_uniform(k_u, (code_num, graph_size))

    # Host-side reference copies (robust even if the input buffers get donated
    # through the aliased pallas_call).
    c_ref = np.asarray(c_embeddings)
    n_ref = np.asarray(n_embeddings)
    u_ref = np.asarray(u_embeddings)

    c_out, n_out, u_out = embedding_layer_forward(c_embeddings, n_embeddings, u_embeddings)
    jax.block_until_ready((c_out, n_out, u_out))

    assert c_out.shape == (code_num, code_size) and c_out.dtype == jnp.float32
    assert n_out.shape == (code_num, code_size) and n_out.dtype == jnp.float32
    assert u_out.shape == (code_num, graph_size) and u_out.dtype == jnp.float32
    assert np.array_equal(np.asarray(c_out), c_ref)
    assert np.array_equal(np.asarray(n_out), n_ref)
    assert np.array_equal(np.asarray(u_out), u_ref)

    print("KERNEL_OK")
</pallas_src>

<mosaic_0001>
module attributes {stable_mosaic.version = 11 : i64} {
  func.func @_embedding_forward_kernel(%arg0: i32, %arg1: memref<8x32xf32, #tpu.memory_space<vmem>>, %arg2: memref<8x32xf32, #tpu.memory_space<vmem>>, %arg3: memref<8x64xf32, #tpu.memory_space<vmem>>, %arg4: memref<8x32xf32, #tpu.memory_space<vmem>>, %arg5: memref<8x32xf32, #tpu.memory_space<vmem>>, %arg6: memref<8x64xf32, #tpu.memory_space<vmem>>) attributes {dimension_semantics = [#tpu.dimension_semantics<parallel>], iteration_bounds = array<i64: 1>, scalar_prefetch = 0 : i64, scratch_operands = 0 : i64, tpu.core_type = #tpu.core_type<tc>, window_params = [{transform_indices = @transform_0, window_bounds = array<i64: 8, 32>}, {transform_indices = @transform_1, window_bounds = array<i64: 8, 32>}, {transform_indices = @transform_2, window_bounds = array<i64: 8, 64>}, {transform_indices = @transform_3, window_bounds = array<i64: 8, 32>}, {transform_indices = @transform_4, window_bounds = array<i64: 8, 32>}, {transform_indices = @transform_5, window_bounds = array<i64: 8, 64>}]} {
    %c0 = arith.constant 0 : index
    %c0_0 = arith.constant 0 : index
    %0 = vector.load %arg1[%c0, %c0_0] : memref<8x32xf32, #tpu.memory_space<vmem>>, vector<8x32xf32>
    %c0_1 = arith.constant 0 : index
    %c0_2 = arith.constant 0 : index
    %1 = vector.load %arg4[%c0_1, %c0_2] : memref<8x32xf32, #tpu.memory_space<vmem>>, vector<8x32xf32>
    tpu.vector_store %arg4[%c0_1, %c0_2], %0 {strides = array<i32>} : memref<8x32xf32, #tpu.memory_space<vmem>>, vector<8x32xf32>,
    %c0_3 = arith.constant 0 : index
    %c0_4 = arith.constant 0 : index
    %2 = vector.load %arg2[%c0_3, %c0_4] : memref<8x32xf32, #tpu.memory_space<vmem>>, vector<8x32xf32>
    %c0_5 = arith.constant 0 : index
    %c0_6 = arith.constant 0 : index
    %3 = vector.load %arg5[%c0_5, %c0_6] : memref<8x32xf32, #tpu.memory_space<vmem>>, vector<8x32xf32>
    tpu.vector_store %arg5[%c0_5, %c0_6], %2 {strides = array<i32>} : memref<8x32xf32, #tpu.memory_space<vmem>>, vector<8x32xf32>,
    %c0_7 = arith.constant 0 : index
    %c0_8 = arith.constant 0 : index
    %4 = vector.load %arg3[%c0_7, %c0_8] : memref<8x64xf32, #tpu.memory_space<vmem>>, vector<8x64xf32>
    %c0_9 = arith.constant 0 : index
    %c0_10 = arith.constant 0 : index
    %5 = vector.load %arg6[%c0_9, %c0_10] : memref<8x64xf32, #tpu.memory_space<vmem>>, vector<8x64xf32>
    tpu.vector_store %arg6[%c0_9, %c0_10], %4 {strides = array<i32>} : memref<8x64xf32, #tpu.memory_space<vmem>>, vector<8x64xf32>,
    return
  }
  func.func @transform_0(%arg0: i32) -> (i32, i32) {
    %c0_i32 = arith.constant 0 : i32
    %c0_i32_0 = arith.constant 0 : i32
    return %arg0, %c0_i32 : i32, i32
  }
  func.func @transform_1(%arg0: i32) -> (i32, i32) {
    %c0_i32 = arith.constant 0 : i32
    %c0_i32_0 = arith.constant 0 : i32
    return %arg0, %c0_i32 : i32, i32
  }
  func.func @transform_2(%arg0: i32) -> (i32, i32) {
    %c0_i32 = arith.constant 0 : i32
    %c0_i32_0 = arith.constant 0 : i32
    return %arg0, %c0_i32 : i32, i32
  }
  func.func @transform_3(%arg0: i32) -> (i32, i32) {
    %c0_i32 = arith.constant 0 : i32
    %c0_i32_0 = arith.constant 0 : i32
    return %arg0, %c0_i32 : i32, i32
  }
  func.func @transform_4(%arg0: i32) -> (i32, i32) {
    %c0_i32 = arith.constant 0 : i32
    %c0_i32_0 = arith.constant 0 : i32
    return %arg0, %c0_i32 : i32, i32
  }
  func.func @transform_5(%arg0: i32) -> (i32, i32) {
    %c0_i32 = arith.constant 0 : i32
    %c0_i32_0 = arith.constant 0 : i32
    return %arg0, %c0_i32 : i32, i32
  }
}

</mosaic_0001>

<bundles_post_ra>
// kernel: tpu_custom_call.1
= control target key start
LH: loop header
LB: loop body
LE: loop exit
PB: predicated region body
PF: predicated region fallthrough
CT: control target
= control target key end

     0   :  { %11 = vsyncpa [#allocation3], 0  ;;  %s293_s0 = inlined_call_operand.hbm [shape: f32[8,32], index: 0, kind: input, shape index: {}, may-alias: {0,3}]   ;;  %s294_s1 = inlined_call_operand.hbm [shape: f32[8,32], index: 1, kind: input, shape index: {}, may-alias: {1,4}]   ;;  %s295_s2 = inlined_call_operand.hbm [shape: f32[8,64], index: 2, kind: input, shape index: {}, may-alias: {2,5}]   ;;  %s296_s3 = inlined_call_operand.hbm [shape: f32[8,32], index: 3, kind: output, shape index: {0}, may-alias: {0,3}]   ;;  %s297_s4 = inlined_call_operand.hbm [shape: f32[8,32], index: 4, kind: output, shape index: {1}, may-alias: {1,4}]   ;;  %s298_s5 = inlined_call_operand.hbm [shape: f32[8,64], index: 5, kind: output, shape index: {2}, may-alias: {2,5}]  }
   0x1   :  { %12 = vsyncpa [#allocation6], 0 }
   0x2   :  { %13 = vsyncpa [#allocation4], 0 }
   0x3   :  { %14 = vsyncpa [#allocation10], 0  ;;  %s239_s18 = smov [#allocation5]   ;;  %s240_s20 = smov [#allocation2]  }
   0x4   :  { %s31_s19 = sshll.u32 %s239_s18, 4  ;;  %s21_s21 = sshll.u32 %s240_s20, 4  ;;  %s32_s19 = int_to_ptr.vmem [resolvable:$true] %s31_s19  ;;  %s22_s21 = int_to_ptr.vmem [resolvable:$true] %s21_s21 }
   0x5   :  { %s119_s22 = scalar_lea.vmem %s32_s19, 128  ;;  %p124_p1 = scmp.lt.s32.totalorder %s32_s19, %s32_s19 }
   0x6   :  { %p120_p0 = scmp.ne.s32.totalorder %s32_s19, %s119_s22  ;;  %p125_p2 = scmp.lt.s32.totalorder %s119_s22, %s119_s22 }
   0x8   :  { %p126_p3 = por %p125_p2, %p124_p1 }
   0xa   :  { %p127_p4 = pnand %p126_p3, %p120_p0 }
   0xc   :  { %130 = shalt.err (!%p127_p4)
}
   0xd   :  { %34 = dma.hbm_to_vmem [thread:$0]  %s294_s1, 128, %s32_s19, [#allocation6]  }
   0xe   :  { %s139_s25 = scalar_lea.vmem %s22_s21, 128  ;;  %p144_p6 = scmp.lt.s32.totalorder %s22_s21, %s22_s21 }
   0xf   :  { %p140_p5 = scmp.ne.s32.totalorder %s22_s21, %s139_s25  ;;  %p145_p7 = scmp.lt.s32.totalorder %s139_s25, %s139_s25 }
  0x11   :  { %p146_p8 = por %p145_p7, %p144_p6 }
  0x13   :  { %p147_p9 = pnand %p146_p8, %p140_p5 }
  0x15   :  { %150 = shalt.err (!%p147_p9)
}
  0x16   :  { %24 = dma.hbm_to_vmem [thread:$0]  %s293_s0, 128, %s22_s21, [#allocation3]  }
  0x17   :  { %s241_s28 = smov [#allocation7]  }
  0x18   :  { %s41_s29 = sshll.u32 %s241_s28, 4  ;;  %s42_s29 = int_to_ptr.vmem [resolvable:$true] %s41_s29 }
  0x19   :  { %s159_s30 = scalar_lea.vmem %s42_s29, 128  ;;  %p164_p11 = scmp.lt.s32.totalorder %s42_s29, %s42_s29 }
  0x1a   :  { %p160_p10 = scmp.ne.s32.totalorder %s42_s29, %s159_s30  ;;  %p165_p12 = scmp.lt.s32.totalorder %s159_s30, %s159_s30 }
  0x1c   :  { %p166_p13 = por %p165_p12, %p164_p11 }
  0x1e   :  { %p167_p0 = pnand %p166_p13, %p160_p10 }
  0x20   :  { %170 = shalt.err (!%p167_p0)
}
  0x21   :  { %44 = dma.hbm_to_vmem [thread:$0]  %s295_s2, 128, %s42_s29, [#allocation6]  }
  0x22   :  { %231 = dma.done.wait [#allocation3], 128  }
  0x23   :  { %232 = vsyncadd [#allocation3], 4294967168 }
  0x24   :  { %233 = dma.done.wait [#allocation6], 256  }
  0x25   :  { %234 = vsyncadd [#allocation6], 4294967040  ;;  %s242_s7 = smov [#allocation9]   ;;  %s243_s8 = smov [#allocation8]   ;;  %vm55_vm0 = vcmask 261120   ;;  %vm60_vm1 = vcmask 523264  }
  0x26   :  { %s78_s0 = sshll.u32 %s242_s7, 4  ;;  %s68_s9 = sshll.u32 %s243_s8, 4  ;;  %v57_v0 = vld [vmem:[#allocation5] sm:$0xff]  ;;  %v54_v1 = vld [vmem:[#allocation2] sm:$0xff]  ;;  %v59_v2 = vld [vmem:[#allocation7] sm:$0xff]  ;;  %s79_s0 = int_to_ptr.vmem [resolvable:$true] %s78_s0  ;;  %s69_s9 = int_to_ptr.vmem [resolvable:$true] %s68_s9 }
  0x27   :  { %s244_s10 = smov [#allocation11]   ;;  %58 = vst.msk [vmem:[#allocation9] sm:$0xff] %vm55_vm0, %v57_v0  ;;  %56 = vst.msk [vmem:[#allocation8] sm:$0xff] %vm55_vm0, %v54_v1  ;;  %s171_s2 = scalar_lea.vmem %s79_s0, 128 }
  0x28   :  { %s88_s11 = sshll.u32 %s244_s10, 4  ;;  %61 = vst.msk [vmem:[#allocation11] sm:$0xff] %vm60_vm1, %v59_v2  ;;  %p172_p1 = scmp.ne.s32.totalorder %s79_s0, %s171_s2  ;;  %s89_s11 = int_to_ptr.vmem [resolvable:$true] %s88_s11 }
  0x29   :  { %p176_p2 = scmp.lt.s32.totalorder %s79_s0, %s79_s0  ;;  %p177_p3 = scmp.lt.s32.totalorder %s171_s2, %s171_s2 }
  0x2b   :  { %p178_p4 = por %p177_p3, %p176_p2 }
  0x2d   :  { %p179_p5 = pnand %p178_p4, %p172_p1 }
  0x2f   :  { %182 = shalt.err (!%p179_p5)
}
  0x30   :  { %81 = dma.vmem_to_hbm [thread:$0]  %s79_s0, 128, %s297_s4, [#allocation10]  }
  0x31   :  { %s191_s14 = scalar_lea.vmem %s69_s9, 128  ;;  %p196_p7 = scmp.lt.s32.totalorder %s69_s9, %s69_s9 }
  0x32   :  { %p192_p6 = scmp.ne.s32.totalorder %s69_s9, %s191_s14  ;;  %p197_p8 = scmp.lt.s32.totalorder %s191_s14, %s191_s14 }
  0x34   :  { %p198_p9 = por %p197_p8, %p196_p7 }
  0x36   :  { %p199_p10 = pnand %p198_p9, %p192_p6 }
  0x38   :  { %202 = shalt.err (!%p199_p10)
}
  0x39   :  { %71 = dma.vmem_to_hbm [thread:$0]  %s69_s9, 128, %s296_s3, [#allocation4]  }
  0x3a   :  { %s211_s17 = scalar_lea.vmem %s89_s11, 128  ;;  %p216_p12 = scmp.lt.s32.totalorder %s89_s11, %s89_s11 }
  0x3b   :  { %p212_p11 = scmp.ne.s32.totalorder %s89_s11, %s211_s17  ;;  %p217_p13 = scmp.lt.s32.totalorder %s211_s17, %s211_s17 }
  0x3d   :  { %p218_p0 = por %p217_p13, %p216_p12 }
  0x3f   :  { %p219_p1 = pnand %p218_p0, %p212_p11 }
  0x41   :  { %222 = shalt.err (!%p219_p1)
}
  0x42   :  { %91 = dma.vmem_to_hbm [thread:$0]  %s89_s11, 128, %s298_s5, [#allocation10]  }
  0x43   :  { %235 = dma.done.wait [#allocation4], 128  }
  0x44   :  { %236 = vsyncadd [#allocation4], 4294967168 }
  0x45   :  { %237 = dma.done.wait [#allocation10], 256  }
  0x46   :  { %238 = vsyncadd [#allocation10], 4294967040 }
  0x47   :  { %101 = vsyncpa [#allocation3], 1 }
  0x48   :  { %102 = vsyncpa [#allocation6], 1 }
  0x49   :  { %103 = vsyncpa [#allocation4], 1 }
  0x4a   :  { %104 = vsyncpa [#allocation10], 1 }

</bundles_post_ra>
